<compile_context>
chip_gen: v7x
topology: tpu7x:2x2x1
jax: 0.10.0
libtpu: 0.0.40
codegen_flags: <defaults>
</compile_context>

<pallas_src>
import math
from collections import OrderedDict
from functools import partial

import jax
import jax.numpy as jnp
from jax import lax
from jax.experimental import pallas as pl
from jax.experimental.pallas import tpu as pltpu

# ---------------- model config (BasicBlock, expansion=1, layers=[1,1,1,1]) ----
BLOCK_INPLANES = [4, 8, 16, 32]
LAYERS = [1, 1, 1, 1]
N_INPUT_CHANNELS = 3
CONV1_T_SIZE = 7
CONV1_T_STRIDE = 1
N_CLASSES = 10
BN_EPS = 1e-5


def _rnd_up(x, m):
    return (x + m - 1) // m * m


def _choose_tm(Mp):
    """Largest M-tile in {512,256,128} that still leaves >=2 parallel blocks."""
    for tm in (512, 256, 128):
        if Mp % tm == 0 and Mp // tm >= 2:
            return tm
    return min(512, Mp)


# ---------------- Pallas kernel: conv-as-matmul with fused BN/residual/ReLU ----
def _conv_mm_kernel(*refs, relu, has_residual):
    if has_residual:
        w_ref, x_ref, s_ref, c_ref, r_ref, o_ref = refs
    else:
        w_ref, x_ref, s_ref, c_ref, o_ref = refs
        r_ref = None
    # (O, K) @ (K, tm) on the MXU; bf16 operands, f32 accumulation.
    acc = jnp.dot(w_ref[...], x_ref[...], preferred_element_type=jnp.float32)
    # Per-output-channel (per-sublane) BN scale/bias, optional residual, ReLU.
    y = acc * s_ref[...] + c_ref[...]
    if has_residual:
        y = y + r_ref[...]
    if relu:
        y = jnp.maximum(y, 0.0)
    o_ref[...] = y


def _pallas_conv_matmul(w, patches, scale, bias, *, relu, residual=None):
    """y[o, m] = [relu]( (sum_k w[o,k] * patches[k,m]) * scale[o] + bias[o] (+ res[o,m]) )

    Orientation: O (4..32) on sublanes (single block, no padding needed), big M
    lane-dense, whole K contraction in one grid step (no scratch accumulator).
    """
    O, K = w.shape
    Kb, M = patches.shape
    assert K == Kb
    Mp = _rnd_up(M, 128)
    tm = _choose_tm(Mp)
    if Mp != M:
        patches = jnp.pad(patches, ((0, 0), (0, Mp - M)))
        if residual is not None:
            residual = jnp.pad(residual, ((0, 0), (0, Mp - M)))

    in_specs = [
        pl.BlockSpec((O, K), lambda j: (0, 0)),    # weights: tiny, resident
        pl.BlockSpec((K, tm), lambda j: (0, j)),   # patches: lane-dense in M
        pl.BlockSpec((O, 1), lambda j: (0, 0)),    # per-channel BN scale
        pl.BlockSpec((O, 1), lambda j: (0, 0)),    # per-channel BN bias
    ]
    args = [w, patches, scale, bias]
    if residual is not None:
        in_specs.append(pl.BlockSpec((O, tm), lambda j: (0, j)))
        args.append(residual.astype(jnp.float32))

    out = pl.pallas_call(
        partial(_conv_mm_kernel, relu=relu, has_residual=residual is not None),
        out_shape=jax.ShapeDtypeStruct((O, Mp), jnp.float32),
        grid=(Mp // tm,),
        in_specs=in_specs,
        out_specs=pl.BlockSpec((O, tm), lambda j: (0, j)),
        compiler_params=pltpu.CompilerParams(
            dimension_semantics=("parallel",),
            vmem_limit_bytes=32 * 1024 * 1024),
    )(*args)
    return out[:, :M] if Mp != M else out


# ---------------- glue: im2col (channel-major), pooling ------------------------
def _im2col_cm(x, ksize, stride, padding):
    """x: (C, N, D, H, W) f32 -> patches (C*kT*kH*kW, N*Do*Ho*Wo) bf16.

    K row order is (C-major, then taps in (kT,kH,kW) raster order), matching
    w.reshape(O, C*kT*kH*kW).  No big transpose is needed in this layout.
    """
    kt, kh, kw = ksize
    st, sh, sw = stride
    pt, ph, pw = padding
    xb = x.astype(jnp.bfloat16)                 # cast BEFORE inflation
    xp = jnp.pad(xb, ((0, 0), (0, 0), (pt, pt), (ph, ph), (pw, pw)))
    C, N, Dp, Hp, Wp = xp.shape
    Do = (Dp - kt) // st + 1
    Ho = (Hp - kh) // sh + 1
    Wo = (Wp - kw) // sw + 1
    if (kt, kh, kw) == (1, 1, 1):
        p = xp[:, :, ::st, ::sh, ::sw]
        return p.reshape(C, N * Do * Ho * Wo), (N, Do, Ho, Wo)
    cols = []
    for it in range(kt):
        for ih in range(kh):
            for iw in range(kw):
                cols.append(xp[:, :, it:it + st * Do:st,
                               ih:ih + sh * Ho:sh, iw:iw + sw * Wo:sw])
    p = jnp.stack(cols, axis=1)                 # (C, T, N, Do, Ho, Wo)
    return p.reshape(C * kt * kh * kw, N * Do * Ho * Wo), (N, Do, Ho, Wo)


def conv3d_bn(x_cm, cw, stride, padding, relu, residual=None):
    """Conv3d(bias=False) + folded BN [+ residual] [+ ReLU] via one Pallas matmul.

    x_cm: (C, N, D, H, W) f32.  Returns (O, N, Do, Ho, Wo) f32.
    """
    patches, (N, Do, Ho, Wo) = _im2col_cm(x_cm, cw["ksize"], stride, padding)
    res_flat = None if residual is None else residual.reshape(cw["O"], -1)
    y = _pallas_conv_matmul(cw["w"], patches, cw["scale"], cw["bias"],
                            relu=relu, residual=res_flat)
    return y.reshape(cw["O"], N, Do, Ho, Wo)


def maxpool3d_cm(x, k=3, s=2, p=1):
    """MaxPool3d(kernel=3, stride=2, padding=1) on (C, N, D, H, W)."""
    init = jnp.array(-jnp.inf, dtype=x.dtype)
    return lax.reduce_window(
        x, init, lax.max,
        window_dimensions=(1, 1, k, k, k),
        window_strides=(1, 1, s, s, s),
        padding=((0, 0), (0, 0), (p, p), (p, p), (p, p)))


# ---------------- parameter init (PyTorch-equivalent, deterministic) ----------
def _bn_default(c):
    return {"gamma": jnp.ones((c,), jnp.float32),
            "beta": jnp.zeros((c,), jnp.float32),
            "mean": jnp.zeros((c,), jnp.float32),
            "var": jnp.ones((c,), jnp.float32)}


def _kaiming_conv(key, out_c, in_c, k):
    fan_out = out_c * k[0] * k[1] * k[2]
    std = math.sqrt(2.0 / fan_out)
    return std * jax.random.normal(key, (out_c, in_c) + tuple(k), jnp.float32)


def _prep_conv(w, bn):
    """Fold inference-mode BN into scale/bias; pre-reshape & cast weights (once)."""
    O = int(w.shape[0])
    scale = bn["gamma"] / jnp.sqrt(bn["var"] + BN_EPS)
    bias = bn["beta"] - bn["mean"] * scale
    return {"w": w.reshape(O, -1).astype(jnp.bfloat16),
            "scale": scale.reshape(O, 1).astype(jnp.float32),
            "bias": bias.reshape(O, 1).astype(jnp.float32),
            "ksize": tuple(int(k) for k in w.shape[2:]),
            "O": O}


def init_params(key):
    params = {}
    in_planes = BLOCK_INPLANES[0]
    key, k = jax.random.split(key)
    params["conv1"] = _prep_conv(
        _kaiming_conv(k, in_planes, N_INPUT_CHANNELS, (CONV1_T_SIZE, 7, 7)),
        _bn_default(in_planes))
    for li, (planes, nblocks, stride) in enumerate(
            zip(BLOCK_INPLANES, LAYERS, (1, 2, 2, 2)), start=1):
        layer = []
        for b in range(nblocks):
            st = stride if b == 0 else 1
            key, k1, k2, k3 = jax.random.split(key, 4)
            bp = {"stride": st,
                  "conv1": _prep_conv(_kaiming_conv(k1, planes, in_planes, (3, 3, 3)),
                                      _bn_default(planes)),
                  "conv2": _prep_conv(_kaiming_conv(k2, planes, planes, (3, 3, 3)),
                                      _bn_default(planes))}
            if b == 0 and (st != 1 or in_planes != planes):   # shortcut_type 'B'
                bp["down"] = _prep_conv(_kaiming_conv(k3, planes, in_planes, (1, 1, 1)),
                                        _bn_default(planes))
            layer.append(bp)
            in_planes = planes
        params[f"layer{li}"] = layer
    key, kw, kb = jax.random.split(key, 3)
    bound = 1.0 / math.sqrt(in_planes)
    params["fc_w"] = jax.random.uniform(kw, (N_CLASSES, in_planes), jnp.float32, -bound, bound)
    params["fc_b"] = jax.random.uniform(kb, (N_CLASSES,), jnp.float32, -bound, bound)
    return params


# ---------------- forward ------------------------------------------------------
def basic_block(x, p):
    st = p["stride"]
    out = conv3d_bn(x, p["conv1"], (st, st, st), (1, 1, 1), relu=True)
    if "down" in p:
        identity = conv3d_bn(x, p["down"], (st, st, st), (0, 0, 0), relu=False)
    else:
        identity = x
    # conv2 + BN + residual-add + ReLU fused into a single Pallas call.
    return conv3d_bn(out, p["conv2"], (1, 1, 1), (1, 1, 1), relu=True,
                     residual=identity)


def resnet_forward(params, x):
    outputs = OrderedDict()
    # NCDHW -> channel-major CNDHW, kept end to end (no per-conv transposes).
    x = x.transpose(1, 0, 2, 3, 4)
    # conv1 + bn1 + relu
    x = conv3d_bn(x, params["conv1"], (CONV1_T_STRIDE, 2, 2),
                  (CONV1_T_SIZE // 2, 3, 3), relu=True)
    outputs["conv1"] = x.transpose(1, 0, 2, 3, 4)
    # maxpool (no_max_pool=False)
    x = maxpool3d_cm(x, k=3, s=2, p=1)
    # residual stages
    for name in ("layer1", "layer2", "layer3", "layer4"):
        for bp in params[name]:
            x = basic_block(x, bp)
        outputs[name] = x.transpose(1, 0, 2, 3, 4)
    # adaptive avg-pool to (1,1,1) + flatten: (C, N, D, H, W) -> (N, C)
    feat = jnp.mean(x, axis=(2, 3, 4)).T
    # final FC: tiny (2x32 @ 32x10); plain dot is cheaper than any padded kernel.
    logits = jnp.dot(feat, params["fc_w"].T,
                     precision=lax.Precision.HIGHEST) + params["fc_b"]
    outputs["fc"] = logits
    return outputs


# ---------------- main ---------------------------------------------------------
if __name__ == "__main__":
    key = jax.random.PRNGKey(0)
    key, xk = jax.random.split(key)
    # small NCDHW input: batch=2, channels=3, D=8, H=W=16
    x = jax.random.normal(xk, (2, N_INPUT_CHANNELS, 8, 16, 16), jnp.float32)
    params = init_params(key)

    outs = resnet_forward(params, x)
    jax.block_until_ready(outs)

    # sanity on shapes
    assert outs["conv1"].shape == (2, 4, 8, 8, 8)
    assert outs["layer1"].shape == (2, 4, 4, 4, 4)
    assert outs["layer4"].shape == (2, 32, 1, 1, 1)
    assert outs["fc"].shape == (2, N_CLASSES)
    print("KERNEL_OK")
</pallas_src>

<mosaic_0001>
module attributes {stable_mosaic.version = 11 : i64} {
  func.func @_conv_mm_kernel(%arg0: i32, %arg1: memref<4x1029xbf16, #tpu.memory_space<vmem>>, %arg2: memref<1029x512xbf16, #tpu.memory_space<vmem>>, %arg3: memref<4x1xf32, #tpu.memory_space<vmem>>, %arg4: memref<4x1xf32, #tpu.memory_space<vmem>>, %arg5: memref<4x512xf32, #tpu.memory_space<vmem>>) attributes {dimension_semantics = [#tpu.dimension_semantics<parallel>], iteration_bounds = array<i64: 2>, scalar_prefetch = 0 : i64, scratch_operands = 0 : i64, tpu.core_type = #tpu.core_type<tc>, window_params = [{pipeline_mode = #tpu.pipeline_mode<synchronous>, transform_indices = @transform_0, window_bounds = array<i64: 4, 1029>}, {transform_indices = @transform_1, window_bounds = array<i64: 1029, 512>}, {pipeline_mode = #tpu.pipeline_mode<synchronous>, transform_indices = @transform_2, window_bounds = array<i64: 4, 1>}, {pipeline_mode = #tpu.pipeline_mode<synchronous>, transform_indices = @transform_3, window_bounds = array<i64: 4, 1>}, {transform_indices = @transform_4, window_bounds = array<i64: 4, 512>}]} {
    %c0 = arith.constant 0 : index
    %c0_0 = arith.constant 0 : index
    %0 = vector.load %arg1[%c0, %c0_0] : memref<4x1029xbf16, #tpu.memory_space<vmem>>, vector<4x1029xbf16>
    %c0_1 = arith.constant 0 : index
    %c0_2 = arith.constant 0 : index
    %1 = vector.load %arg2[%c0_1, %c0_2] : memref<1029x512xbf16, #tpu.memory_space<vmem>>, vector<1029x512xbf16>
    %cst = arith.constant dense<0.000000e+00> : vector<4x512xf32>
    %2 = tpu.matmul %0, %1, %cst {dimension_numbers = #tpu.dot_dimension_numbers<[1], [0], [0], [1], [0, 0, 1, 1], [], []>} : vector<4x1029xbf16>, vector<1029x512xbf16>, vector<4x512xf32> -> vector<4x512xf32>
    %c0_3 = arith.constant 0 : index
    %c0_4 = arith.constant 0 : index
    %3 = vector.load %arg3[%c0_3, %c0_4] : memref<4x1xf32, #tpu.memory_space<vmem>>, vector<4x1xf32>
    %4 = vector.broadcast %3 : vector<4x1xf32> to vector<4x512xf32>
    %5 = arith.mulf %2, %4 : vector<4x512xf32>
    %c0_5 = arith.constant 0 : index
    %c0_6 = arith.constant 0 : index
    %6 = vector.load %arg4[%c0_5, %c0_6] : memref<4x1xf32, #tpu.memory_space<vmem>>, vector<4x1xf32>
    %7 = vector.broadcast %6 : vector<4x1xf32> to vector<4x512xf32>
    %8 = arith.addf %5, %7 : vector<4x512xf32>
    %cst_7 = arith.constant 0.000000e+00 : f32
    %9 = vector.broadcast %cst_7 : f32 to vector<4x512xf32>
    %10 = arith.maximumf %8, %9 : vector<4x512xf32>
    %c0_8 = arith.constant 0 : index
    %c0_9 = arith.constant 0 : index
    %11 = vector.load %arg5[%c0_8, %c0_9] : memref<4x512xf32, #tpu.memory_space<vmem>>, vector<4x512xf32>
    tpu.vector_store %arg5[%c0_8, %c0_9], %10 {strides = array<i32>} : memref<4x512xf32, #tpu.memory_space<vmem>>, vector<4x512xf32>,
    return
  }
  func.func @transform_0(%arg0: i32) -> (i32, i32) {
    %c0_i32 = arith.constant 0 : i32
    %c0_i32_0 = arith.constant 0 : i32
    %c0_i32_1 = arith.constant 0 : i32
    return %c0_i32, %c0_i32_0 : i32, i32
  }
  func.func @transform_1(%arg0: i32) -> (i32, i32) {
    %c0_i32 = arith.constant 0 : i32
    %c0_i32_0 = arith.constant 0 : i32
    return %c0_i32, %arg0 : i32, i32
  }
  func.func @transform_2(%arg0: i32) -> (i32, i32) {
    %c0_i32 = arith.constant 0 : i32
    %c0_i32_0 = arith.constant 0 : i32
    %c0_i32_1 = arith.constant 0 : i32
    return %c0_i32, %c0_i32_0 : i32, i32
  }
  func.func @transform_3(%arg0: i32) -> (i32, i32) {
    %c0_i32 = arith.constant 0 : i32
    %c0_i32_0 = arith.constant 0 : i32
    %c0_i32_1 = arith.constant 0 : i32
    return %c0_i32, %c0_i32_0 : i32, i32
  }
  func.func @transform_4(%arg0: i32) -> (i32, i32) {
    %c0_i32 = arith.constant 0 : i32
    %c0_i32_0 = arith.constant 0 : i32
    return %c0_i32, %arg0 : i32, i32
  }
}

</mosaic_0001>

<bundles_post_ra>
// kernel: tpu_custom_call.1
= control target key start
LH: loop header
LB: loop body
LE: loop exit
PB: predicated region body
PF: predicated region fallthrough
CT: control target
= control target key end

     0   :  { %9 = vsyncpa [#allocation3], 0  ;;  %s3822_s0 = inlined_call_operand.hbm [shape: bf16[4,1029], index: 0, kind: input, shape index: {}]   ;;  %s3823_s1 = inlined_call_operand.hbm [shape: bf16[1029,1024], index: 1, kind: input, shape index: {}]   ;;  %s3824_s2 = inlined_call_operand.vmem [shape: f32[4,1], index: 2, kind: input, shape index: {}]   ;;  %s3825_s3 = inlined_call_operand.vmem [shape: f32[4,1], index: 3, kind: input, shape index: {}]   ;;  %s3826_s4 = inlined_call_operand.hbm [shape: f32[4,1024], index: 4, kind: output, shape index: {}]  }
   0x1   :  { %10 = vsyncpa [#allocation6], 0 }
   0x2   :  { %12 = vsyncpa [#allocation6 + $0x1], 0 }
   0x3   :  { %13 = vsyncpa [#allocation4], 0 }
   0x4   :  { %15 = vsyncpa [#allocation4 + $0x1], 0  ;;  %s3327_s15 = smov 0   ;;  %s3329_s16 = smov 0  }
   0x5   :  { %s3331_s17 = smov 0   ;;  %s3333_s18 = smov 0  }
   0x6 LB: > { %s3348_s19 = sadd.s32 4294967295, %s3291_s18   ;;  %s2396_s20 = sadd.s32 4294967294, %s3291_s18   ;;  %s3291_s18 = sphi %s3333_s18, %s3851_s18   ;;  %s3287_s17 = sphi %s3331_s17, %s3850_s17   ;;  %s3283_s16 = sphi %s3329_s16, %s3849_s16   ;;  %s3279_s15 = sphi %s3327_s15, %s3848_s15  }
   0x7   : > { %s3352_s21 = sadd.s32 1, %s3291_s18   ;;  %s49_s22 = sadd.s32 1, %s3287_s17 }
   0x8   : > { %s46_s23 = ssub.s32 %s3291_s18, %s3352_s21  ;;  %p56_p0 = scmp.ne.s32.totalorder %s3287_s17, %s3283_s16 }
   0x9   : > { %p47_p1 = scmp.eq.s32.totalorder %s46_s23, 0  ;;  %p57_p2 = scmp.eq.s32.totalorder %s3291_s18, 0 }
   0xa   : > { %p62_p3 = scmp.ne.s32.totalorder %s3283_s16, %s3279_s15  ;;  %p3827_p4 = scmp.eq.s32.totalorder %s3348_s19, 0 }
   0xb   : > { %s3364_s24 = scalar_select %p47_p1, %s3287_s17, %s49_s22  }
   0xc   : > { %p3366_p5 = por %p57_p2, %p56_p0  ;;  %p3372_p6 = por %p3827_p4, %p62_p3 }
   0xd   : > { %p128_p7 = scmp.eq.s32.totalorder %s3348_s19, 1  ;;  %p134_p8 = scmp.eq.s32.totalorder %s2396_s20, 1 }
   0xe   : > { %s3833_s26 = scalar_select %p3372_p6, 1, 0 }
   0xf   : > { %p2397_p9 = scmp.ge.s32.totalorder %s3291_s18, 1  ;;  %p141_p10 = scmp.lt.s32.totalorder %s3291_s18, 3 }
  0x10   : > { %p3379_p11 = por %p128_p7, %p56_p0  ;;  %p3383_p12 = por %p134_p8, %p62_p3 }
  0x11   : > { %p3387_p13 = pnand %p2397_p9, %p141_p10  ;;  %s3293_s30 = smov [#allocation2]  }
  0x12   : > { %s3834_s27 = scalar_select %p3379_p11, 1, 0 }
  0x13   : > { %s3835_s28 = scalar_select %p3383_p12, 1, 0 }
  0x14   : > { %s3836_s29 = scalar_select %p3387_p13, 1, 0 }
  0x15   : > { %p2717_p2 = pneg %p3387_p13  ;;  %s154_s5 = sshll.u32 %s3293_s30, 4  ;;  %s155_s5 = int_to_ptr.vmem [resolvable:$true] %s154_s5 }
  0x16   : > { %p2730_p4 = scmp.lt.s32.totalorder %s3291_s18, 2  ;;  %p3837_p0 = scmp.eq.s32.totalorder %s3348_s19, 0 }
  0x17   : > { %s171_s7 = sand.u32 1, %s3287_s17   ;;  %s3163_s12 = scalar_lea.hbm %s3822_s0, 288 }
  0x18   : > { %p3397_p7 = pnand %p2717_p2, %p3837_p0  ;;  %p3404_p3 = pnand %p2730_p4, %p3366_p5 }
  0x19   : > { %s2707_s9 = smul.u32 2064, %s171_s7  ;;  %p3164_p8 = scmp.ne.s32.totalorder %s3822_s0, %s3163_s12 }
  0x1a   : > { %s3839_s8 = scalar_select %p3404_p3, 1, 0 }
  0x1b   : > { %p3165_p9 = pneg %p3397_p7  ;;  %p3170_p4 = scmp.lt.u32.totalorder %s3163_s12, %s3822_s0 }
  0x1d   : > { %p3166_p10 = pnand %p3165_p9, %p3164_p8 }
  0x1f   : > { %p3167_p2 = pneg %p3166_p10 }
  0x21   : > { %p3172_p5 = pnand %p3170_p4, %p3167_p2 }
  0x23   : > { %3175 = shalt.err (!%p3172_p5)
}
  0x24   : > { %s3176_s23 = scalar_lea.vmem %s155_s5, 288  ;;  %p3184_p11 = scmp.lt.s32.totalorder %s155_s5, %s155_s5 }
  0x25   : > { %p3177_p0 = scmp.ne.s32.totalorder %s155_s5, %s3176_s23  ;;  %p3185_p6 = scmp.lt.s32.totalorder %s3176_s23, %s3176_s23 }
  0x27   : > { %p3179_p1 = pnand %p3177_p0, %p3165_p9  ;;  %p3186_p13 = por %p3185_p6, %p3184_p11 }
  0x29   : > { %p3180_p12 = pneg %p3179_p1 }
  0x2b   : > { %p3187_p3 = pnand %p3186_p13, %p3180_p12 }
  0x2d   : > { %3190 = shalt.err (!%p3187_p3)
}
  0x2e   : > { %2720 = dma.hbm_to_vmem [thread:$0]  (!%p3397_p7), %s3822_s0, 288, %s155_s5, [#allocation3]  }
  0x2f   : > { %s2673_s10 = sshll.u32 %s3291_s18, 8  ;;  %s175_s11 = scalar_lea.vmem [#allocation5], %s2707_s9 }
  0x30   : > { %s182_s12 = sshll.u32 %s175_s11, 4  ;;  %s3428_s20 = scalar_lea.hbm %s3823_s1, %s2673_s10  ;;  %s3430_s12 = int_to_ptr.vmem [resolvable:$true] %s182_s12 }
  0x31   : > { %s3432_s6 = scalar_lea.sflag [#allocation6], %s171_s7  ;;  %s3191_s22 = scalar_lea.hbm %s3428_s20, 33024 }
  0x32   : > { %p3192_p6 = scmp.ne.s32.totalorder %s3428_s20, %s3191_s22  ;;  %p3840_p11 = scmp.ne.s32.totalorder %s3839_s8, 0 }
  0x33   : > { %s3196_s23 = scalar_lea.hbm %s3823_s1, 66048  ;;  %p3197_p7 = scmp.lt.u32.totalorder %s3428_s20, %s3823_s1 }
  0x34   : > { %p3193_p12 = pneg %p3840_p11  ;;  %p3198_p3 = scmp.lt.u32.totalorder %s3196_s23, %s3191_s22 }
  0x35   : > { %p3200_p9 = scmp.lt.u32.totalorder %s3191_s22, %s3428_s20 }
  0x36   : > { %p3194_p13 = pnand %p3193_p12, %p3192_p6  ;;  %p3199_p8 = por %p3198_p3, %p3197_p7 }
  0x38   : > { %p3195_p1 = pneg %p3194_p13  ;;  %p3201_p10 = por %p3200_p9, %p3199_p8 }
  0x3a   : > { %p3202_p2 = pnand %p3201_p10, %p3195_p1 }
  0x3c   : > { %3205 = shalt.err (!%p3202_p2)
}
  0x3d   : > { %s3206_s7 = scalar_lea.vmem %s3430_s12, 33024  ;;  %s3294_s10 = smov [#allocation5]  }
  0x3e   : > { %p3207_p4 = scmp.ne.s32.totalorder %s3430_s12, %s3206_s7  ;;  %s3211_s11 = sshll.u32 %s3294_s10, 4  ;;  %s3212_s11 = int_to_ptr.vmem [resolvable:$false] %s3211_s11 }
  0x3f   : > { %s3213_s13 = scalar_lea.vmem %s3212_s11, 66048  ;;  %p3214_p6 = scmp.lt.s32.totalorder %s3430_s12, %s3212_s11 }
  0x40   : > { %p3209_p5 = pnand %p3207_p4, %p3193_p12  ;;  %p3215_p13 = scmp.lt.s32.totalorder %s3213_s13, %s3206_s7 }
  0x42   : > { %p3210_p0 = pneg %p3209_p5  ;;  %p3216_p7 = por %p3215_p13, %p3214_p6 }
  0x44   : > { %p3217_p3 = pnand %p3216_p7, %p3210_p0 }
  0x46   : > { %3220 = shalt.err (!%p3217_p3)
}
  0x47   : > { %s3295_s14 = smov 512   ;;  %s3296_s22 = smov 256  }
  0x48   : > { %s3297_s5 = smov 16   ;;  %p3841_p12 = scmp.ne.s32.totalorder %s3836_s29, 0 }
  0x49   : > { %2724 = dma.hbm_to_vmem [thread:$0]  (!%p3840_p11), %s3428_s20, 33024, %s3430_s12, %s3432_s6, %s3295_s14, %s3296_s22, %s3297_s5  }
  0x4a   : > { %194 = sbr.rel (%p3841_p12) target bundleno = 591 (0x24f), region = 36  ;;  %p3842_p1 = scmp.eq.s32.totalorder (!%p3841_p12), %s3348_s19, 0 }
  0x51   : > { %3266 = dma.done.wait (%p3842_p1), [#allocation3], 288   ;;  %p3843_p8 = pmov %p3842_p1 }
  0x52   : > { %s3467_s9 = sand.u32 1, %s3283_s16   ;;  %p3844_p11 = scmp.ne.s32.totalorder %s3833_s26, 0 }
  0x53   : > { %3268 = vsyncadd (%p3843_p8), [#allocation3], 4294967008  ;;  %s2708_s23 = smul.u32 2064, %s3467_s9  ;;  %s201_s25 = scalar_lea.sflag [#allocation6], %s3467_s9 }
  0x55   : > { %s3471_s30 = scalar_lea.vmem [#allocation5], %s2708_s23 }
  0x56   : > { %3270 = dma.done.wait (%p3844_p11), %s201_s25, 33024  }
  0x57   : > { %3272 = vsyncadd (%p3844_p11), %s201_s25, 4294934272  ;;  %v2773_v0 = vld [vmem:[%s3471_s30 + $0x4] ss:$16 sps:$4 sm:$0xff]   ;;  %v2775_v1 = vld [vmem:[%s3471_s30 + $0xc] ss:$16 sps:$4 sm:$0xff]   ;;  %v500_v38 = vlaneseq  ;;  %vm1839_vm0 = vcmask 1041408  }
  0x58   : > { %1855 = vmatprep.subr.bf16.mxu0 %v2773_v0  ;;  %v2777_v2 = vld [vmem:[%s3471_s30] ss:$16 sps:$4 sm:$0xff]   ;;  %v2778_v3 = vld [vmem:[%s3471_s30 + $0x8] ss:$16 sps:$4 sm:$0xff]   ;;  %2060 = vmatprep.subr.bf16.mxu1 %v2775_v1  ;;  %v2779_v4 = vld [vmem:[%s3471_s30 + $0x24] ss:$16 sps:$4 sm:$0xff]  }
  0x59   : > { %1856 = vmatpush1.bf16.msra.mxu0 %v2777_v2  ;;  %2061 = vmatpush1.bf16.msra.mxu1 %v2778_v3  ;;  %v2781_v5 = vld [vmem:[%s3471_s30 + $0x2c] ss:$16 sps:$4 sm:$0xff]   ;;  %v2783_v6 = vld [vmem:[%s3471_s30 + $0x20] ss:$16 sps:$4 sm:$0xff]   ;;  %v2784_v7 = vld [vmem:[%s3471_s30 + $0x28] ss:$16 sps:$4 sm:$0xff]  }
  0x5a   : > { %1857 = vmatprep.subr.bf16.mxu0 %v2779_v4  ;;  %2062 = vmatprep.subr.bf16.mxu1 %v2781_v5  ;;  %v2785_v8 = vld [vmem:[%s3471_s30 + $0x44] ss:$16 sps:$4 sm:$0xff]   ;;  %v2787_v9 = vld [vmem:[%s3471_s30 + $0x4c] ss:$16 sps:$4 sm:$0xff]   ;;  %v2789_v10 = vld [vmem:[%s3471_s30 + $0x40] ss:$16 sps:$4 sm:$0xff]  }
  0x5b   : > { %v2790_v11 = vld [vmem:[%s3471_s30 + $0x48] ss:$16 sps:$4 sm:$0xff]   ;;  %v2791_v12 = vld [vmem:[%s3471_s30 + $0x64] ss:$16 sps:$4 sm:$0xff]   ;;  %v2793_v13 = vld [vmem:[%s3471_s30 + $0x6c] ss:$16 sps:$4 sm:$0xff]  }
  0x5c   : > { %v2795_v14 = vld [vmem:[%s3471_s30 + $0x60] ss:$16 sps:$4 sm:$0xff]   ;;  %v2796_v15 = vld [vmem:[%s3471_s30 + $0x68] ss:$16 sps:$4 sm:$0xff]   ;;  %v2797_v16 = vld [vmem:[%s3471_s30 + $0x84] ss:$16 sps:$4 sm:$0xff]  }
  0x5d   : > { %1858 = vmatpush1.bf16.msra.mxu0 %v2783_v6  ;;  %2063 = vmatpush1.bf16.msra.mxu1 %v2784_v7  ;;  %v2799_v17 = vld [vmem:[%s3471_s30 + $0x8c] ss:$16 sps:$4 sm:$0xff]   ;;  %v2801_v18 = vld [vmem:[%s3471_s30 + $0x80] ss:$16 sps:$4 sm:$0xff]   ;;  %v2802_v19 = vld [vmem:[%s3471_s30 + $0x88] ss:$16 sps:$4 sm:$0xff]  }
  0x5e   : > { %1859 = vmatprep.subr.bf16.mxu0 %v2785_v8  ;;  %2064 = vmatprep.subr.bf16.mxu1 %v2787_v9  ;;  %v2803_v20 = vld [vmem:[%s3471_s30 + $0xa4] ss:$16 sps:$4 sm:$0xff]   ;;  %v2805_v21 = vld [vmem:[%s3471_s30 + $0xac] ss:$16 sps:$4 sm:$0xff]   ;;  %v2807_v22 = vld [vmem:[%s3471_s30 + $0xa0] ss:$16 sps:$4 sm:$0xff]  }
  0x5f   : > { %v2808_v23 = vld [vmem:[%s3471_s30 + $0xa8] ss:$16 sps:$4 sm:$0xff]   ;;  %v2809_v24 = vld [vmem:[%s3471_s30 + $0xc4] ss:$16 sps:$4 sm:$0xff]   ;;  %v2811_v25 = vld [vmem:[%s3471_s30 + $0xcc] ss:$16 sps:$4 sm:$0xff]  }
  0x60   : > { %v2813_v26 = vld [vmem:[%s3471_s30 + $0xc0] ss:$16 sps:$4 sm:$0xff]   ;;  %v2814_v27 = vld [vmem:[%s3471_s30 + $0xc8] ss:$16 sps:$4 sm:$0xff]   ;;  %v2815_v28 = vld [vmem:[%s3471_s30 + $0xe4] ss:$16 sps:$4 sm:$0xff]  }
  0x61   : > { %1860 = vmatpush1.bf16.msra.mxu0 %v2789_v10  ;;  %2065 = vmatpush1.bf16.msra.mxu1 %v2790_v11  ;;  %v2817_v29 = vld [vmem:[%s3471_s30 + $0xec] ss:$16 sps:$4 sm:$0xff]   ;;  %v2819_v30 = vld [vmem:[%s3471_s30 + $0xe0] ss:$16 sps:$4 sm:$0xff]   ;;  %v2820_v31 = vld [vmem:[%s3471_s30 + $0xe8] ss:$16 sps:$4 sm:$0xff]  }
  0x62   : > { %1861 = vmatprep.subr.bf16.mxu0 %v2791_v12  ;;  %2066 = vmatprep.subr.bf16.mxu1 %v2793_v13  ;;  %v2821_v32 = vld [vmem:[%s3471_s30 + $0x104] ss:$16 sps:$4 sm:$0xff]   ;;  %v2823_v33 = vld [vmem:[%s3471_s30 + $0x10c] ss:$16 sps:$4 sm:$0xff]   ;;  %v2825_v34 = vld [vmem:[%s3471_s30 + $0x100] ss:$16 sps:$4 sm:$0xff]  }
  0x63   : > { %v2826_v35 = vld [vmem:[%s3471_s30 + $0x108] ss:$16 sps:$4 sm:$0xff]   ;;  %v3298_v36 = vmov 1983009808   ;;  %v2827_v39 = vld [vmem:[%s3471_s30 + $0x124] ss:$16 sps:$4 sm:$0xff]  }
  0x64   : > { %v498_v37 = vunpack.c.l.s4 %v3298_v36  ;;  %v2829_v40 = vld [vmem:[%s3471_s30 + $0x12c] ss:$16 sps:$4 sm:$0xff]   ;;  %v2831_v41 = vld [vmem:[%s3471_s30 + $0x120] ss:$16 sps:$4 sm:$0xff]   ;;  %v501_v43 = vshrl.u32 %v500_v38, 7  ;;  %vm1840_vm1 = vcmask 1042432  }
  0x65   : > { %1862 = vmatpush1.bf16.msra.mxu0 %v2795_v14  ;;  %2067 = vmatpush1.bf16.msra.mxu1 %v2796_v15  ;;  %v2832_v44 = vld [vmem:[%s3471_s30 + $0x128] ss:$16 sps:$4 sm:$0xff]   ;;  %v2833_v45 = vld [vmem:[%s3471_s30 + $0x144] ss:$16 sps:$4 sm:$0xff]   ;;  %v2835_v46 = vld [vmem:[%s3471_s30 + $0x14c] ss:$16 sps:$4 sm:$0xff]  }
  0x66   : > { %1863 = vmatprep.subr.bf16.mxu0 %v2797_v16  ;;  %2068 = vmatprep.subr.bf16.mxu1 %v2799_v17  ;;  %v499_v42 = vunpack.c.0.s8 %v498_v37  ;;  %v2837_v47 = vld [vmem:[%s3471_s30 + $0x140] ss:$16 sps:$4 sm:$0xff]   ;;  %v2838_v48 = vld [vmem:[%s3471_s30 + $0x148] ss:$16 sps:$4 sm:$0xff]   ;;  %v2839_v50 = vld [vmem:[%s3471_s30 + $0x164] ss:$16 sps:$4 sm:$0xff]  }
  0x67   : > { %v2841_v51 = vld [vmem:[%s3471_s30 + $0x16c] ss:$16 sps:$4 sm:$0xff]   ;;  %v2843_v53 = vld [vmem:[%s3471_s30 + $0x160] ss:$16 sps:$4 sm:$0xff]   ;;  %v2844_v55 = vld [vmem:[%s3471_s30 + $0x168] ss:$16 sps:$4 sm:$0xff]  }
  0x68   : > { %v3521_v49 = vsub.s32 %v499_v42, %v501_v43  ;;  %v232_v52 = vld [vmem:[#allocation2] sm:$0xff]  ;;  %v2850_v60 = vld [vmem:[%s3471_s30 + $0x188] ss:$16 sps:$4 sm:$0xff]   ;;  %vm1835_vm2 = vcmask 39936   ;;  %s2404_s20 = sshll.u32 %s3467_s9, 4  ;;  %s2674_s6 = sshll.u32 %s3348_s19, 8 }
  0x69   : > { %1864 = vmatpush1.bf16.msra.mxu0 %v2801_v18  ;;  %2069 = vmatpush1.bf16.msra.mxu1 %v2802_v19  ;;  %v2845_v56 = vld [vmem:[%s3471_s30 + $0x184] ss:$16 sps:$4 sm:$0xff]   ;;  %v2847_v57 = vld [vmem:[%s3471_s30 + $0x18c] ss:$16 sps:$4 sm:$0xff]   ;;  %v2849_v59 = vld [vmem:[%s3471_s30 + $0x180] ss:$16 sps:$4 sm:$0xff]   ;;  %v496_v7 = vcombine.high %v232_v52, %v232_v52  ;;  %s3778_s14 = scalar_lea.hbm %s3826_s4, %s2674_s6 }
  0x6a   : > { %1865 = vmatprep.subr.bf16.mxu0 %v2803_v20  ;;  %2070 = vmatprep.subr.bf16.mxu1 %v2805_v21  ;;  %v503_v54 = vrot.slane %v232_v52, %v3521_v49  ;;  %v2851_v61 = vld [vmem:[%s3471_s30 + $0x1a4] ss:$16 sps:$4 sm:$0xff]   ;;  %v2853_v62 = vld [vmem:[%s3471_s30 + $0x1ac] ss:$16 sps:$4 sm:$0xff]   ;;  %v2855_v63 = vld [vmem:[%s3471_s30 + $0x1a0] ss:$16 sps:$4 sm:$0xff]  }
  0x6b   : > { %v2856_v0 = vld [vmem:[%s3471_s30 + $0x1a8] ss:$16 sps:$4 sm:$0xff]   ;;  %v2857_v1 = vld [vmem:[%s3471_s30 + $0x1c4] ss:$16 sps:$4 sm:$0xff]   ;;  %v2859_v2 = vld [vmem:[%s3471_s30 + $0x1cc] ss:$16 sps:$4 sm:$0xff]   ;;  %v3547_v12 = vrot.slane %v496_v7, %v3521_v49 }
  0x6c   : > { %v511_v58 = vcombine.high %v503_v54, %v503_v54  ;;  %v2861_v3 = vld [vmem:[%s3471_s30 + $0x1c0] ss:$16 sps:$4 sm:$0xff]   ;;  %v2862_v4 = vld [vmem:[%s3471_s30 + $0x1c8] ss:$16 sps:$4 sm:$0xff]   ;;  %v2863_v5 = vld [vmem:[%s3471_s30 + $0x1e4] ss:$16 sps:$4 sm:$0xff]  }
  0x6d   : > { %1866 = vmatpush1.bf16.msra.mxu0 %v2807_v22  ;;  %2071 = vmatpush1.bf16.msra.mxu1 %v2808_v23  ;;  %v2865_v6 = vld [vmem:[%s3471_s30 + $0x1ec] ss:$16 sps:$4 sm:$0xff]   ;;  %v2867_v8 = vld [vmem:[%s3471_s30 + $0x1e0] ss:$16 sps:$4 sm:$0xff]   ;;  %v2868_v9 = vld [vmem:[%s3471_s30 + $0x1e8] ss:$16 sps:$4 sm:$0xff]   ;;  %v512_v17 = vcombine.high %v3547_v12, %v3547_v12 }
  0x6e   : > { %1867 = vmatprep.subr.bf16.mxu0 %v2809_v24  ;;  %2072 = vmatprep.subr.bf16.mxu1 %v2811_v25  ;;  %v2872_v10 = vld [vmem:[%s3471_s30 + $0x204] ss:$16 sps:$4 sm:$0xff]   ;;  %v2875_v11 = vld [vmem:[%s3471_s30 + $0x20c] ss:$16 sps:$4 sm:$0xff]   ;;  %v2870_v13 = vld [vmem:[%s3471_s30 + $0x200] ss:$16 sps:$4 sm:$0xff]  }
  0x6f   : > { %1887 = vmatprep.mubr.bf16.mxu0 %v511_v58  ;;  %2092 = vmatprep.mubr.bf16.mxu1 %v511_v58  ;;  %v2873_v14 = vld [vmem:[%s3471_s30 + $0x208] ss:$16 sps:$4 sm:$0xff]   ;;  %v2878_v15 = vld [vmem:[%s3471_s30 + $0x224] ss:$16 sps:$4 sm:$0xff]   ;;  %v2881_v16 = vld [vmem:[%s3471_s30 + $0x22c] ss:$16 sps:$4 sm:$0xff]  }
  0x70   : > { %v2876_v18 = vld [vmem:[%s3471_s30 + $0x220] ss:$16 sps:$4 sm:$0xff]   ;;  %v2879_v19 = vld [vmem:[%s3471_s30 + $0x228] ss:$16 sps:$4 sm:$0xff]   ;;  %v2884_v20 = vld [vmem:[%s3471_s30 + $0x244] ss:$16 sps:$4 sm:$0xff]  }
  0x71   : > { %1868 = vmatpush1.bf16.msra.mxu0 %v2813_v26  ;;  %2073 = vmatpush1.bf16.msra.mxu1 %v2814_v27  ;;  %v2887_v21 = vld [vmem:[%s3471_s30 + $0x24c] ss:$16 sps:$4 sm:$0xff]   ;;  %v2882_v22 = vld [vmem:[%s3471_s30 + $0x240] ss:$16 sps:$4 sm:$0xff]   ;;  %v2885_v23 = vld [vmem:[%s3471_s30 + $0x248] ss:$16 sps:$4 sm:$0xff]  }
  0x72   : > { %1869 = vmatprep.subr.bf16.mxu0 %v2815_v28  ;;  %2074 = vmatprep.subr.bf16.mxu1 %v2817_v29  ;;  %v2890_v24 = vld [vmem:[%s3471_s30 + $0x264] ss:$16 sps:$4 sm:$0xff]   ;;  %v2893_v25 = vld [vmem:[%s3471_s30 + $0x26c] ss:$16 sps:$4 sm:$0xff]   ;;  %v2888_v26 = vld [vmem:[%s3471_s30 + $0x260] ss:$16 sps:$4 sm:$0xff]  }
  0x73   : > { %v2891_v27 = vld [vmem:[%s3471_s30 + $0x268] ss:$16 sps:$4 sm:$0xff]   ;;  %v2896_v28 = vld [vmem:[%s3471_s30 + $0x284] ss:$16 sps:$4 sm:$0xff]   ;;  %v2899_v29 = vld [vmem:[%s3471_s30 + $0x28c] ss:$16 sps:$4 sm:$0xff]  }
  0x74   : > { %v2908_v36 = vld [vmem:[%s3471_s30 + $0x2c4] ss:$16 sps:$4 sm:$0xff]   ;;  %v2911_v37 = vld [vmem:[%s3471_s30 + $0x2cc] ss:$16 sps:$4 sm:$0xff]   ;;  %v2906_v38 = vld [vmem:[%s3471_s30 + $0x2c0] ss:$16 sps:$4 sm:$0xff]  }
  0x75   : > { %1870 = vmatpush1.bf16.msra.mxu0 %v2819_v30  ;;  %2075 = vmatpush1.bf16.msra.mxu1 %v2820_v31  ;;  %v2894_v30 = vld [vmem:[%s3471_s30 + $0x280] ss:$16 sps:$4 sm:$0xff]   ;;  %v2897_v31 = vld [vmem:[%s3471_s30 + $0x288] ss:$16 sps:$4 sm:$0xff]   ;;  %v2941_v58 = vld [vmem:[%s3471_s30 + $0x36c] ss:$16 sps:$4 sm:$0xff]  }
  0x76   : > { %1871 = vmatprep.subr.bf16.mxu0 %v2821_v32  ;;  %2076 = vmatprep.subr.bf16.mxu1 %v2823_v33  ;;  %v2902_v32 = vld [vmem:[%s3471_s30 + $0x2a4] ss:$16 sps:$4 sm:$0xff]   ;;  %v2905_v33 = vld [vmem:[%s3471_s30 + $0x2ac] ss:$16 sps:$4 sm:$0xff]   ;;  %v2912_v42 = vld [vmem:[%s3471_s30 + $0x2e0] ss:$16 sps:$4 sm:$0xff]  }
  0x77   : > { %v2915_v43 = vld [vmem:[%s3471_s30 + $0x2e8] ss:$16 sps:$4 sm:$0xff]   ;;  %v2954_v7 = vld [vmem:[%s3471_s30 + $0x3c0] ss:$16 sps:$4 sm:$0xff]   ;;  %s228_s7 = scalar_lea.vmem [#allocation7], %s2404_s20  ;;  %s2300_s22 = scalar_lea.sflag [#allocation4], %s3467_s9 }
  0x78   : > { %v2927_v52 = vld [vmem:[%s3471_s30 + $0x328] ss:$16 sps:$4 sm:$0xff]   ;;  %s2314_s10 = sshll.u32 %s228_s7, 4  ;;  %p3845_p10 = scmp.ne.s32.totalorder %s3834_s27, 0  ;;  %s3780_s10 = int_to_ptr.vmem [resolvable:$true] %s2314_s10 }
  0x79   : > { %1872 = vmatpush1.bf16.msra.mxu0 %v2825_v34  ;;  %2077 = vmatpush1.bf16.msra.mxu1 %v2826_v35  ;;  %v2900_v34 = vld [vmem:[%s3471_s30 + $0x2a0] ss:$16 sps:$4 sm:$0xff]   ;;  %v2903_v35 = vld [vmem:[%s3471_s30 + $0x2a8] ss:$16 sps:$4 sm:$0xff]   ;;  %s3221_s19 = scalar_lea.vmem %s3780_s10, 256  ;;  %s3301_s5 = smov [#allocation7]  }
  0x7a   : > { %1873 = vmatprep.subr.bf16.mxu0 %v2827_v39  ;;  %2078 = vmatprep.subr.bf16.mxu1 %v2829_v40  ;;  %v2909_v39 = vld [vmem:[%s3471_s30 + $0x2c8] ss:$16 sps:$4 sm:$0xff]   ;;  %v2914_v40 = vld [vmem:[%s3471_s30 + $0x2e4] ss:$16 sps:$4 sm:$0xff]   ;;  %p3222_p9 = scmp.ne.s32.totalorder %s3780_s10, %s3221_s19  ;;  %s3225_s23 = sshll.u32 %s3301_s5, 4  ;;  %s3226_s23 = int_to_ptr.vmem [resolvable:$false] %s3225_s23 }
  0x7b   : > { %s3227_s25 = scalar_lea.vmem %s3226_s23, 512  ;;  %p3228_p5 = scmp.lt.s32.totalorder %s3780_s10, %s3226_s23 }
  0x7c   : > { %p3223_p2 = pnand %p3222_p9, %p3845_p10  ;;  %p3229_p0 = scmp.lt.s32.totalorder %s3227_s25, %s3221_s19 }
  0x7d   : > { %1874 = vmatpush1.bf16.msra.mxu0 %v2831_v41  ;;  %2079 = vmatpush1.bf16.msra.mxu1 %v2832_v44  ;;  %v2917_v41 = vld [vmem:[%s3471_s30 + $0x2ec] ss:$16 sps:$4 sm:$0xff]   ;;  %v2920_v44 = vld [vmem:[%s3471_s30 + $0x304] ss:$16 sps:$4 sm:$0xff]  }
  0x7e   : > { %1875 = vmatprep.subr.bf16.mxu0 %v2833_v45  ;;  %2080 = vmatprep.subr.bf16.mxu1 %v2835_v46  ;;  %v2923_v45 = vld [vmem:[%s3471_s30 + $0x30c] ss:$16 sps:$4 sm:$0xff]   ;;  %v2918_v46 = vld [vmem:[%s3471_s30 + $0x300] ss:$16 sps:$4 sm:$0xff]   ;;  %p3224_p4 = pneg %p3223_p2  ;;  %p3230_p6 = por %p3229_p0, %p3228_p5 }
  0x80   : > { %p3231_p13 = pnand %p3230_p6, %p3224_p4 }
  0x81   : > { %1876 = vmatpush1.bf16.msra.mxu0 %v2837_v47  ;;  %2081 = vmatpush1.bf16.msra.mxu1 %v2838_v48  ;;  %v2921_v47 = vld [vmem:[%s3471_s30 + $0x308] ss:$16 sps:$4 sm:$0xff]   ;;  %v2926_v48 = vld [vmem:[%s3471_s30 + $0x324] ss:$16 sps:$4 sm:$0xff]  }
  0x82   : > { %1877 = vmatprep.subr.bf16.mxu0 %v2839_v50  ;;  %2082 = vmatprep.subr.bf16.mxu1 %v2841_v51  ;;  %v2929_v50 = vld [vmem:[%s3471_s30 + $0x32c] ss:$16 sps:$4 sm:$0xff]   ;;  %v2924_v51 = vld [vmem:[%s3471_s30 + $0x320] ss:$16 sps:$4 sm:$0xff]  }
  0x85   : > { %1878 = vmatpush1.bf16.msra.mxu0 %v2843_v53  ;;  %2083 = vmatpush1.bf16.msra.mxu1 %v2844_v55  ;;  %v2932_v53 = vld [vmem:[%s3471_s30 + $0x344] ss:$16 sps:$4 sm:$0xff]   ;;  %v2930_v55 = vld [vmem:[%s3471_s30 + $0x340] ss:$16 sps:$4 sm:$0xff]  }
  0x86   : > { %1879 = vmatprep.subr.bf16.mxu0 %v2845_v56  ;;  %2084 = vmatprep.subr.bf16.mxu1 %v2847_v57  ;;  %v2933_v56 = vld [vmem:[%s3471_s30 + $0x348] ss:$16 sps:$4 sm:$0xff]   ;;  %v2938_v57 = vld [vmem:[%s3471_s30 + $0x364] ss:$16 sps:$4 sm:$0xff]  }
  0x89   : > { %1880 = vmatpush1.bf16.msra.mxu0 %v2849_v59  ;;  %2085 = vmatpush1.bf16.msra.mxu1 %v2850_v60  ;;  %v2936_v59 = vld [vmem:[%s3471_s30 + $0x360] ss:$16 sps:$4 sm:$0xff]   ;;  %v2939_v60 = vld [vmem:[%s3471_s30 + $0x368] ss:$16 sps:$4 sm:$0xff]  }
  0x8a   : > { %1881 = vmatprep.subr.bf16.mxu0 %v2851_v61  ;;  %2086 = vmatprep.subr.bf16.mxu1 %v2853_v62  ;;  %v2944_v61 = vld [vmem:[%s3471_s30 + $0x384] ss:$16 sps:$4 sm:$0xff]   ;;  %v2947_v62 = vld [vmem:[%s3471_s30 + $0x38c] ss:$16 sps:$4 sm:$0xff]  }
  0x8d   : > { %1882 = vmatpush1.bf16.msra.mxu0 %v2855_v63  ;;  %2087 = vmatpush1.bf16.msra.mxu1 %v2856_v0  ;;  %v2942_v63 = vld [vmem:[%s3471_s30 + $0x380] ss:$16 sps:$4 sm:$0xff]   ;;  %v2945_v0 = vld [vmem:[%s3471_s30 + $0x388] ss:$16 sps:$4 sm:$0xff]  }
  0x8e   : > { %1883 = vmatprep.subr.bf16.mxu0 %v2857_v1  ;;  %2088 = vmatprep.subr.bf16.mxu1 %v2859_v2  ;;  %v2950_v1 = vld [vmem:[%s3471_s30 + $0x3a4] ss:$16 sps:$4 sm:$0xff]   ;;  %v2953_v2 = vld [vmem:[%s3471_s30 + $0x3ac] ss:$16 sps:$4 sm:$0xff]  }
  0x91   : > { %1884 = vmatpush1.bf16.msra.mxu0 %v2861_v3  ;;  %2089 = vmatpush1.bf16.msra.mxu1 %v2862_v4  ;;  %v2948_v3 = vld [vmem:[%s3471_s30 + $0x3a0] ss:$16 sps:$4 sm:$0xff]   ;;  %v2951_v4 = vld [vmem:[%s3471_s30 + $0x3a8] ss:$16 sps:$4 sm:$0xff]  }
  0x92   : > { %1885 = vmatprep.subr.bf16.mxu0 %v2863_v5  ;;  %2090 = vmatprep.subr.bf16.mxu1 %v2865_v6  ;;  %v2956_v5 = vld [vmem:[%s3471_s30 + $0x3c4] ss:$16 sps:$4 sm:$0xff]   ;;  %v2959_v6 = vld [vmem:[%s3471_s30 + $0x3cc] ss:$16 sps:$4 sm:$0xff]  }
  0x95   : > { %1886 = vmatpush1.bf16.msra.mxu0 %v2867_v8  ;;  %2091 = vmatpush1.bf16.msra.mxu1 %v2868_v9  ;;  %v2957_v8 = vld [vmem:[%s3471_s30 + $0x3c8] ss:$16 sps:$4 sm:$0xff]   ;;  %v2962_v9 = vld [vmem:[%s3471_s30 + $0x3e4] ss:$16 sps:$4 sm:$0xff]  }
  0x96   : > { %1896 = vmatprep.subr.bf16.mxu0 %v2872_v10  ;;  %2101 = vmatprep.subr.bf16.mxu1 %v2875_v11  ;;  %v2965_v10 = vld [vmem:[%s3471_s30 + $0x3ec] ss:$16 sps:$4 sm:$0xff]   ;;  %v2960_v11 = vld [vmem:[%s3471_s30 + $0x3e0] ss:$16 sps:$4 sm:$0xff]  }
  0x98   : > { %1888 = vmatmul.mubr.bf16.vlgmr.msra.gmra.mrb[0].mxu0 %v503_v54  ;;  %2093 = vmatmul.mubr.bf16.vlgmr.msra.gmra.mrb[0].mxu1 %v503_v54  ;;  %v2935_v54 = vld [vmem:[%s3471_s30 + $0x34c] ss:$16 sps:$4 sm:$0xff]  }
  0x99   : > { %1897 = vmatpush1.bf16.msra.mxu0 %v2870_v13  ;;  %2102 = vmatpush1.bf16.msra.mxu1 %v2873_v14  ;;  %v2963_v13 = vld [vmem:[%s3471_s30 + $0x3e8] ss:$16 sps:$4 sm:$0xff]   ;;  %v2968_v14 = vld [vmem:[%s3471_s30 + $0x404] ss:$16 sps:$4 sm:$0xff]  }
  0x9a   : > { %1898 = vmatprep.subr.bf16.mxu0 %v2878_v15  ;;  %2103 = vmatprep.subr.bf16.mxu1 %v2881_v16  ;;  %v2971_v15 = vld [vmem:[%s3471_s30 + $0x40c] ss:$16 sps:$4 sm:$0xff]   ;;  %v2966_v16 = vld [vmem:[%s3471_s30 + $0x400] ss:$16 sps:$4 sm:$0xff]  }
  0x9b   : > { %1928 = vmatprep.mubr.bf16.mxu0 %v512_v17  ;;  %2133 = vmatprep.mubr.bf16.mxu1 %v512_v17  ;;  %v2969_v17 = vld [vmem:[%s3471_s30 + $0x408] ss:$16 sps:$4 sm:$0xff]  }
  0x9d   : > { %1899 = vmatpush1.bf16.msra.mxu0 %v2876_v18  ;;  %2104 = vmatpush1.bf16.msra.mxu1 %v2879_v19  ;;  %v3617_v18 = vld [vmem:[#allocation2 + $0x8] sm:$0xff] }
  0x9e   : > { %1900 = vmatprep.subr.bf16.mxu0 %v2884_v20  ;;  %2105 = vmatprep.subr.bf16.mxu1 %v2887_v21  ;;  %v2974_v19 = vld [vmem:[%s3471_s30 + $0x424] ss:$16 sps:$4 sm:$0xff]   ;;  %v2977_v20 = vld [vmem:[%s3471_s30 + $0x42c] ss:$16 sps:$4 sm:$0xff]   ;;  %v3623_v21 = vrot.slane %v3617_v18, %v3521_v49 }
  0xa1   : > { %1901 = vmatpush1.bf16.msra.mxu0 %v2882_v22  ;;  %2106 = vmatpush1.bf16.msra.mxu1 %v2885_v23  ;;  %v528_v22 = vcombine.high %v3623_v21, %v3623_v21  ;;  %v2972_v23 = vld [vmem:[%s3471_s30 + $0x420] ss:$16 sps:$4 sm:$0xff]  }
  0xa2   : > { %1902 = vmatprep.subr.bf16.mxu0 %v2890_v24  ;;  %2107 = vmatprep.subr.bf16.mxu1 %v2893_v25  ;;  %v2975_v24 = vld [vmem:[%s3471_s30 + $0x428] ss:$16 sps:$4 sm:$0xff]   ;;  %v2980_v25 = vld [vmem:[%s3471_s30 + $0x444] ss:$16 sps:$4 sm:$0xff]  }
  0xa5   : > { %1903 = vmatpush1.bf16.msra.mxu0 %v2888_v26  ;;  %2108 = vmatpush1.bf16.msra.mxu1 %v2891_v27  ;;  %v2983_v26 = vld [vmem:[%s3471_s30 + $0x44c] ss:$16 sps:$4 sm:$0xff]   ;;  %v2978_v27 = vld [vmem:[%s3471_s30 + $0x440] ss:$16 sps:$4 sm:$0xff]  }
  0xa6   : > { %1904 = vmatprep.subr.bf16.mxu0 %v2896_v28  ;;  %2109 = vmatprep.subr.bf16.mxu1 %v2899_v29  ;;  %v2981_v28 = vld [vmem:[%s3471_s30 + $0x448] ss:$16 sps:$4 sm:$0xff]   ;;  %v2986_v29 = vld [vmem:[%s3471_s30 + $0x464] ss:$16 sps:$4 sm:$0xff]  }
  0xa9   : > { %1905 = vmatpush1.bf16.msra.mxu0 %v2894_v30  ;;  %2110 = vmatpush1.bf16.msra.mxu1 %v2897_v31  ;;  %v2989_v30 = vld [vmem:[%s3471_s30 + $0x46c] ss:$16 sps:$4 sm:$0xff]   ;;  %v2984_v31 = vld [vmem:[%s3471_s30 + $0x460] ss:$16 sps:$4 sm:$0xff]  }
  0xaa   : > { %1906 = vmatprep.subr.bf16.mxu0 %v2902_v32  ;;  %2111 = vmatprep.subr.bf16.mxu1 %v2905_v33  ;;  %v2987_v32 = vld [vmem:[%s3471_s30 + $0x468] ss:$16 sps:$4 sm:$0xff]   ;;  %v2992_v33 = vld [vmem:[%s3471_s30 + $0x484] ss:$16 sps:$4 sm:$0xff]  }
  0xad   : > { %1907 = vmatpush1.bf16.msra.mxu0 %v2900_v34  ;;  %2112 = vmatpush1.bf16.msra.mxu1 %v2903_v35  ;;  %v2995_v34 = vld [vmem:[%s3471_s30 + $0x48c] ss:$16 sps:$4 sm:$0xff]   ;;  %v2990_v35 = vld [vmem:[%s3471_s30 + $0x480] ss:$16 sps:$4 sm:$0xff]  }
  0xae   : > { %1908 = vmatprep.subr.bf16.mxu0 %v2908_v36  ;;  %2113 = vmatprep.subr.bf16.mxu1 %v2911_v37  ;;  %v2993_v36 = vld [vmem:[%s3471_s30 + $0x488] ss:$16 sps:$4 sm:$0xff]   ;;  %v2998_v37 = vld [vmem:[%s3471_s30 + $0x4a4] ss:$16 sps:$4 sm:$0xff]  }
  0xb1   : > { %1909 = vmatpush1.bf16.msra.mxu0 %v2906_v38  ;;  %2114 = vmatpush1.bf16.msra.mxu1 %v2909_v39  ;;  %v3001_v38 = vld [vmem:[%s3471_s30 + $0x4ac] ss:$16 sps:$4 sm:$0xff]   ;;  %v2996_v39 = vld [vmem:[%s3471_s30 + $0x4a0] ss:$16 sps:$4 sm:$0xff]  }
  0xb2   : > { %1910 = vmatprep.subr.bf16.mxu0 %v2914_v40  ;;  %2115 = vmatprep.subr.bf16.mxu1 %v2917_v41  ;;  %v2999_v40 = vld [vmem:[%s3471_s30 + $0x4a8] ss:$16 sps:$4 sm:$0xff]   ;;  %v3004_v41 = vld [vmem:[%s3471_s30 + $0x4c4] ss:$16 sps:$4 sm:$0xff]  }
  0xb5   : > { %1911 = vmatpush1.bf16.msra.mxu0 %v2912_v42  ;;  %2116 = vmatpush1.bf16.msra.mxu1 %v2915_v43  ;;  %v3007_v42 = vld [vmem:[%s3471_s30 + $0x4cc] ss:$16 sps:$4 sm:$0xff]   ;;  %v3002_v43 = vld [vmem:[%s3471_s30 + $0x4c0] ss:$16 sps:$4 sm:$0xff]  }
  0xb6   : > { %1912 = vmatprep.subr.bf16.mxu0 %v2920_v44  ;;  %2117 = vmatprep.subr.bf16.mxu1 %v2923_v45  ;;  %v3005_v44 = vld [vmem:[%s3471_s30 + $0x4c8] ss:$16 sps:$4 sm:$0xff]   ;;  %v3010_v45 = vld [vmem:[%s3471_s30 + $0x4e4] ss:$16 sps:$4 sm:$0xff]  }
  0xb9   : > { %1913 = vmatpush1.bf16.msra.mxu0 %v2918_v46  ;;  %2118 = vmatpush1.bf16.msra.mxu1 %v2921_v47  ;;  %v3013_v46 = vld [vmem:[%s3471_s30 + $0x4ec] ss:$16 sps:$4 sm:$0xff]   ;;  %v3008_v47 = vld [vmem:[%s3471_s30 + $0x4e0] ss:$16 sps:$4 sm:$0xff]  }
  0xba   : > { %1914 = vmatprep.subr.bf16.mxu0 %v2926_v48  ;;  %2119 = vmatprep.subr.bf16.mxu1 %v2929_v50  ;;  %v3011_v48 = vld [vmem:[%s3471_s30 + $0x4e8] ss:$16 sps:$4 sm:$0xff]   ;;  %v3016_v50 = vld [vmem:[%s3471_s30 + $0x504] ss:$16 sps:$4 sm:$0xff]  }
  0xbd   : > { %1915 = vmatpush1.bf16.msra.mxu0 %v2924_v51  ;;  %2120 = vmatpush1.bf16.msra.mxu1 %v2927_v52  ;;  %v3019_v51 = vld [vmem:[%s3471_s30 + $0x50c] ss:$16 sps:$4 sm:$0xff]   ;;  %v3014_v52 = vld [vmem:[%s3471_s30 + $0x500] ss:$16 sps:$4 sm:$0xff]  }
  0xbe   : > { %1916 = vmatprep.subr.bf16.mxu0 %v2932_v53  ;;  %2121 = vmatprep.subr.bf16.mxu1 %v2935_v54  ;;  %v3017_v53 = vld [vmem:[%s3471_s30 + $0x508] ss:$16 sps:$4 sm:$0xff]   ;;  %v3022_v54 = vld [vmem:[%s3471_s30 + $0x524] ss:$16 sps:$4 sm:$0xff]  }
  0xc1   : > { %1917 = vmatpush1.bf16.msra.mxu0 %v2930_v55  ;;  %2122 = vmatpush1.bf16.msra.mxu1 %v2933_v56  ;;  %v3025_v55 = vld [vmem:[%s3471_s30 + $0x52c] ss:$16 sps:$4 sm:$0xff]   ;;  %v3020_v56 = vld [vmem:[%s3471_s30 + $0x520] ss:$16 sps:$4 sm:$0xff]  }
  0xc2   : > { %1918 = vmatprep.subr.bf16.mxu0 %v2938_v57  ;;  %2123 = vmatprep.subr.bf16.mxu1 %v2941_v58  ;;  %v3023_v57 = vld [vmem:[%s3471_s30 + $0x528] ss:$16 sps:$4 sm:$0xff]   ;;  %v3028_v58 = vld [vmem:[%s3471_s30 + $0x544] ss:$16 sps:$4 sm:$0xff]  }
  0xc5   : > { %1919 = vmatpush1.bf16.msra.mxu0 %v2936_v59  ;;  %2124 = vmatpush1.bf16.msra.mxu1 %v2939_v60  ;;  %v3031_v59 = vld [vmem:[%s3471_s30 + $0x54c] ss:$16 sps:$4 sm:$0xff]   ;;  %v3026_v60 = vld [vmem:[%s3471_s30 + $0x540] ss:$16 sps:$4 sm:$0xff]  }
  0xc6   : > { %1920 = vmatprep.subr.bf16.mxu0 %v2944_v61  ;;  %2125 = vmatprep.subr.bf16.mxu1 %v2947_v62  ;;  %v3029_v61 = vld [vmem:[%s3471_s30 + $0x548] ss:$16 sps:$4 sm:$0xff]   ;;  %v3034_v62 = vld [vmem:[%s3471_s30 + $0x564] ss:$16 sps:$4 sm:$0xff]  }
  0xc9   : > { %1921 = vmatpush1.bf16.msra.mxu0 %v2942_v63  ;;  %2126 = vmatpush1.bf16.msra.mxu1 %v2945_v0  ;;  %v3037_v63 = vld [vmem:[%s3471_s30 + $0x56c] ss:$16 sps:$4 sm:$0xff]   ;;  %v3032_v0 = vld [vmem:[%s3471_s30 + $0x560] ss:$16 sps:$4 sm:$0xff]  }
  0xca   : > { %1922 = vmatprep.subr.bf16.mxu0 %v2950_v1  ;;  %2127 = vmatprep.subr.bf16.mxu1 %v2953_v2  ;;  %v3035_v1 = vld [vmem:[%s3471_s30 + $0x568] ss:$16 sps:$4 sm:$0xff]   ;;  %v2265_v2 = vld [vmem:[%s3824_s2] sm:$0xf] }
  0xcd   : > { %1923 = vmatpush1.bf16.msra.mxu0 %v2948_v3  ;;  %2128 = vmatpush1.bf16.msra.mxu1 %v2951_v4  ;;  %v3040_v3 = vld [vmem:[%s3471_s30 + $0x584] ss:$16 sps:$4 sm:$0xff]   ;;  %v3043_v4 = vld [vmem:[%s3471_s30 + $0x58c] ss:$16 sps:$4 sm:$0xff]  }
  0xce   : > { %1924 = vmatprep.subr.bf16.mxu0 %v2956_v5  ;;  %2129 = vmatprep.subr.bf16.mxu1 %v2959_v6  ;;  %v2275_v5 = vld [vmem:[%s3825_s3] sm:$0xf] }
  0xcf   : > { %v3038_v6 = vld [vmem:[%s3471_s30 + $0x580] ss:$16 sps:$4 sm:$0xff]  }
  0xd1   : > { %1925 = vmatpush1.bf16.msra.mxu0 %v2954_v7  ;;  %2130 = vmatpush1.bf16.msra.mxu1 %v2957_v8  ;;  %v3041_v7 = vld [vmem:[%s3471_s30 + $0x588] ss:$16 sps:$4 sm:$0xff]   ;;  %v3046_v8 = vld [vmem:[%s3471_s30 + $0x5a4] ss:$16 sps:$4 sm:$0xff]  }
  0xd2   : > { %1926 = vmatprep.subr.bf16.mxu0 %v2962_v9  ;;  %2131 = vmatprep.subr.bf16.mxu1 %v2965_v10  ;;  %v3049_v9 = vld [vmem:[%s3471_s30 + $0x5ac] ss:$16 sps:$4 sm:$0xff]   ;;  %v3044_v10 = vld [vmem:[%s3471_s30 + $0x5a0] ss:$16 sps:$4 sm:$0xff]  }
  0xd5   : > { %1927 = vmatpush1.bf16.msra.mxu0 %v2960_v11  ;;  %2132 = vmatpush1.bf16.msra.mxu1 %v2963_v13  ;;  %v3047_v11 = vld [vmem:[%s3471_s30 + $0x5a8] ss:$16 sps:$4 sm:$0xff]   ;;  %v3052_v13 = vld [vmem:[%s3471_s30 + $0x5c4] ss:$16 sps:$4 sm:$0xff]  }
  0xd6   : > { %1937 = vmatprep.subr.bf16.mxu0 %v2968_v14  ;;  %2142 = vmatprep.subr.bf16.mxu1 %v2971_v15  ;;  %v3055_v14 = vld [vmem:[%s3471_s30 + $0x5cc] ss:$16 sps:$4 sm:$0xff]   ;;  %v3050_v15 = vld [vmem:[%s3471_s30 + $0x5c0] ss:$16 sps:$4 sm:$0xff]  }
  0xd8   : > { %1929 = vmatmul.mubr.bf16.vlgmr.msra.gmra.mrb[0].mxu0 %v3547_v12  ;;  %2134 = vmatmul.mubr.bf16.vlgmr.msra.gmra.mrb[0].mxu1 %v3547_v12  ;;  %v3299_v12 = vmov 0  }
  0xd9   : > { %1938 = vmatpush1.bf16.msra.mxu0 %v2966_v16  ;;  %2143 = vmatpush1.bf16.msra.mxu1 %v2969_v17  ;;  %v3053_v16 = vld [vmem:[%s3471_s30 + $0x5c8] ss:$16 sps:$4 sm:$0xff]   ;;  %v3058_v17 = vld [vmem:[%s3471_s30 + $0x5e4] ss:$16 sps:$4 sm:$0xff]  }
  0xda   : > { %1939 = vmatprep.subr.bf16.mxu0 %v2974_v19  ;;  %2144 = vmatprep.subr.bf16.mxu1 %v2977_v20  ;;  %v3061_v19 = vld [vmem:[%s3471_s30 + $0x5ec] ss:$16 sps:$4 sm:$0xff]   ;;  %v513_v20 = vcombine.high %v3617_v18, %v3617_v18  ;;  %v3065_v18 = vld [vmem:[%s3471_s30 + $0x608] ss:$16 sps:$4 sm:$0xff]  }
  0xdb   : > { %1969 = vmatprep.mubr.bf16.mxu0 %v528_v22  ;;  %2174 = vmatprep.mubr.bf16.mxu1 %v528_v22  ;;  %v3056_v22 = vld [vmem:[%s3471_s30 + $0x5e0] ss:$16 sps:$4 sm:$0xff]  }
  0xdc   : > { %2772 = vset.pattern.permute.xlu0 %v3299_v12 }
  0xdd   : > { %1940 = vmatpush1.bf16.msra.mxu0 %v2972_v23  ;;  %2145 = vmatpush1.bf16.msra.mxu1 %v2975_v24  ;;  %v3059_v23 = vld [vmem:[%s3471_s30 + $0x5e8] ss:$16 sps:$4 sm:$0xff]   ;;  %v3064_v24 = vld [vmem:[%s3471_s30 + $0x604] ss:$16 sps:$4 sm:$0xff]  }
  0xde   : > { %1941 = vmatprep.subr.bf16.mxu0 %v2980_v25  ;;  %2146 = vmatprep.subr.bf16.mxu1 %v2983_v26  ;;  %v3067_v25 = vld [vmem:[%s3471_s30 + $0x60c] ss:$16 sps:$4 sm:$0xff]   ;;  %v3699_v26 = vrot.slane %v513_v20, %v3521_v49  ;;  %v3068_v49 = vld [vmem:[%s3471_s30 + $0x620] ss:$16 sps:$4 sm:$0xff]  }
  0xdf   : > { %2268 = vperm.xlu0 %2772, %v2265_v2   ;;  %v3122_v2 = vld [vmem:[%s3471_s30 + $0x740] ss:$16 sps:$4 sm:$0xff]  }
  0xe0   : > { %v491_v20 = vld [vmem:[%s3471_s30 + $0x800] sm:$0x77] }
  0xe1   : > { %1942 = vmatpush1.bf16.msra.mxu0 %v2978_v27  ;;  %2147 = vmatpush1.bf16.msra.mxu1 %v2981_v28  ;;  %v3062_v27 = vld [vmem:[%s3471_s30 + $0x600] ss:$16 sps:$4 sm:$0xff]   ;;  %v3070_v28 = vld [vmem:[%s3471_s30 + $0x624] ss:$16 sps:$4 sm:$0xff]  }
  0xe2   : > { %1943 = vmatprep.subr.bf16.mxu0 %v2986_v29  ;;  %2148 = vmatprep.subr.bf16.mxu1 %v2989_v30  ;;  %v3073_v29 = vld [vmem:[%s3471_s30 + $0x62c] ss:$16 sps:$4 sm:$0xff]   ;;  %v529_v30 = vcombine.high %v3699_v26, %v3699_v26 }
  0xe3   : > { %2278 = vperm.xlu0 %2772, %v2275_v5   ;;  %v3133_v5 = vld [vmem:[%s3471_s30 + $0x76c] ss:$16 sps:$4 sm:$0xff]  }
  0xe5   : > { %1944 = vmatpush1.bf16.msra.mxu0 %v2984_v31  ;;  %2149 = vmatpush1.bf16.msra.mxu1 %v2987_v32  ;;  %v3071_v31 = vld [vmem:[%s3471_s30 + $0x628] ss:$16 sps:$4 sm:$0xff]   ;;  %v3076_v32 = vld [vmem:[%s3471_s30 + $0x644] ss:$16 sps:$4 sm:$0xff]  }
  0xe6   : > { %1945 = vmatprep.subr.bf16.mxu0 %v2992_v33  ;;  %2150 = vmatprep.subr.bf16.mxu1 %v2995_v34  ;;  %v3079_v33 = vld [vmem:[%s3471_s30 + $0x64c] ss:$16 sps:$4 sm:$0xff]   ;;  %v3074_v34 = vld [vmem:[%s3471_s30 + $0x640] ss:$16 sps:$4 sm:$0xff]  }
  0xe9   : > { %1946 = vmatpush1.bf16.msra.mxu0 %v2990_v35  ;;  %2151 = vmatpush1.bf16.msra.mxu1 %v2993_v36  ;;  %v3082_v35 = vld [vmem:[%s3471_s30 + $0x664] ss:$16 sps:$4 sm:$0xff]   ;;  %v3085_v36 = vld [vmem:[%s3471_s30 + $0x66c] ss:$16 sps:$4 sm:$0xff]  }
  0xea   : > { %1947 = vmatprep.subr.bf16.mxu0 %v2998_v37  ;;  %2152 = vmatprep.subr.bf16.mxu1 %v3001_v38  ;;  %v3080_v37 = vld [vmem:[%s3471_s30 + $0x660] ss:$16 sps:$4 sm:$0xff]   ;;  %v3083_v38 = vld [vmem:[%s3471_s30 + $0x668] ss:$16 sps:$4 sm:$0xff]  }
  0xed   : > { %1948 = vmatpush1.bf16.msra.mxu0 %v2996_v39  ;;  %2153 = vmatpush1.bf16.msra.mxu1 %v2999_v40  ;;  %v3088_v39 = vld [vmem:[%s3471_s30 + $0x684] ss:$16 sps:$4 sm:$0xff]   ;;  %v3091_v40 = vld [vmem:[%s3471_s30 + $0x68c] ss:$16 sps:$4 sm:$0xff]  }
  0xee   : > { %1949 = vmatprep.subr.bf16.mxu0 %v3004_v41  ;;  %2154 = vmatprep.subr.bf16.mxu1 %v3007_v42  ;;  %v3086_v41 = vld [vmem:[%s3471_s30 + $0x680] ss:$16 sps:$4 sm:$0xff]   ;;  %v3089_v42 = vld [vmem:[%s3471_s30 + $0x688] ss:$16 sps:$4 sm:$0xff]  }
  0xf1   : > { %1950 = vmatpush1.bf16.msra.mxu0 %v3002_v43  ;;  %2155 = vmatpush1.bf16.msra.mxu1 %v3005_v44  ;;  %v3094_v43 = vld [vmem:[%s3471_s30 + $0x6a4] ss:$16 sps:$4 sm:$0xff]   ;;  %v3097_v44 = vld [vmem:[%s3471_s30 + $0x6ac] ss:$16 sps:$4 sm:$0xff]  }
  0xf2   : > { %1951 = vmatprep.subr.bf16.mxu0 %v3010_v45  ;;  %2156 = vmatprep.subr.bf16.mxu1 %v3013_v46  ;;  %v3092_v45 = vld [vmem:[%s3471_s30 + $0x6a0] ss:$16 sps:$4 sm:$0xff]   ;;  %v3095_v46 = vld [vmem:[%s3471_s30 + $0x6a8] ss:$16 sps:$4 sm:$0xff]  }
  0xf5   : > { %1952 = vmatpush1.bf16.msra.mxu0 %v3008_v47  ;;  %2157 = vmatpush1.bf16.msra.mxu1 %v3011_v48  ;;  %v3100_v47 = vld [vmem:[%s3471_s30 + $0x6c4] ss:$16 sps:$4 sm:$0xff]   ;;  %v3103_v48 = vld [vmem:[%s3471_s30 + $0x6cc] ss:$16 sps:$4 sm:$0xff]  }
  0xf6   : > { %1953 = vmatprep.subr.bf16.mxu0 %v3016_v50  ;;  %2158 = vmatprep.subr.bf16.mxu1 %v3019_v51  ;;  %v3098_v50 = vld [vmem:[%s3471_s30 + $0x6c0] ss:$16 sps:$4 sm:$0xff]   ;;  %v3101_v51 = vld [vmem:[%s3471_s30 + $0x6c8] ss:$16 sps:$4 sm:$0xff]  }
  0xf9   : > { %1954 = vmatpush1.bf16.msra.mxu0 %v3014_v52  ;;  %2159 = vmatpush1.bf16.msra.mxu1 %v3017_v53  ;;  %v3106_v52 = vld [vmem:[%s3471_s30 + $0x6e4] ss:$16 sps:$4 sm:$0xff]   ;;  %v3109_v53 = vld [vmem:[%s3471_s30 + $0x6ec] ss:$16 sps:$4 sm:$0xff]  }
  0xfa   : > { %1955 = vmatprep.subr.bf16.mxu0 %v3022_v54  ;;  %2160 = vmatprep.subr.bf16.mxu1 %v3025_v55  ;;  %v3104_v54 = vld [vmem:[%s3471_s30 + $0x6e0] ss:$16 sps:$4 sm:$0xff]   ;;  %v3107_v55 = vld [vmem:[%s3471_s30 + $0x6e8] ss:$16 sps:$4 sm:$0xff]  }
  0xfd   : > { %1956 = vmatpush1.bf16.msra.mxu0 %v3020_v56  ;;  %2161 = vmatpush1.bf16.msra.mxu1 %v3023_v57  ;;  %v3112_v56 = vld [vmem:[%s3471_s30 + $0x704] ss:$16 sps:$4 sm:$0xff]   ;;  %v3115_v57 = vld [vmem:[%s3471_s30 + $0x70c] ss:$16 sps:$4 sm:$0xff]  }
  0xfe   : > { %1957 = vmatprep.subr.bf16.mxu0 %v3028_v58  ;;  %2162 = vmatprep.subr.bf16.mxu1 %v3031_v59  ;;  %v3110_v58 = vld [vmem:[%s3471_s30 + $0x700] ss:$16 sps:$4 sm:$0xff]   ;;  %v3113_v59 = vld [vmem:[%s3471_s30 + $0x708] ss:$16 sps:$4 sm:$0xff]  }
 0x101   : > { %1958 = vmatpush1.bf16.msra.mxu0 %v3026_v60  ;;  %2163 = vmatpush1.bf16.msra.mxu1 %v3029_v61  ;;  %v3118_v60 = vld [vmem:[%s3471_s30 + $0x724] ss:$16 sps:$4 sm:$0xff]   ;;  %v3121_v61 = vld [vmem:[%s3471_s30 + $0x72c] ss:$16 sps:$4 sm:$0xff]  }
 0x102   : > { %1959 = vmatprep.subr.bf16.mxu0 %v3034_v62  ;;  %2164 = vmatprep.subr.bf16.mxu1 %v3037_v63  ;;  %v3116_v62 = vld [vmem:[%s3471_s30 + $0x720] ss:$16 sps:$4 sm:$0xff]   ;;  %v3119_v63 = vld [vmem:[%s3471_s30 + $0x728] ss:$16 sps:$4 sm:$0xff]  }
 0x105   : > { %1960 = vmatpush1.bf16.msra.mxu0 %v3032_v0  ;;  %2165 = vmatpush1.bf16.msra.mxu1 %v3035_v1  ;;  %v3124_v0 = vld [vmem:[%s3471_s30 + $0x744] ss:$16 sps:$4 sm:$0xff]   ;;  %v3127_v1 = vld [vmem:[%s3471_s30 + $0x74c] ss:$16 sps:$4 sm:$0xff]  }
 0x106   : > { %1961 = vmatprep.subr.bf16.mxu0 %v3040_v3  ;;  %2166 = vmatprep.subr.bf16.mxu1 %v3043_v4  ;;  %v3125_v3 = vld [vmem:[%s3471_s30 + $0x748] ss:$16 sps:$4 sm:$0xff]   ;;  %v3130_v4 = vld [vmem:[%s3471_s30 + $0x764] ss:$16 sps:$4 sm:$0xff]  }
 0x109   : > { %1962 = vmatpush1.bf16.msra.mxu0 %v3038_v6  ;;  %2167 = vmatpush1.bf16.msra.mxu1 %v3041_v7  ;;  %v3128_v6 = vld [vmem:[%s3471_s30 + $0x760] ss:$16 sps:$4 sm:$0xff]   ;;  %v3131_v7 = vld [vmem:[%s3471_s30 + $0x768] ss:$16 sps:$4 sm:$0xff]  }
 0x10a   : > { %1963 = vmatprep.subr.bf16.mxu0 %v3046_v8  ;;  %2168 = vmatprep.subr.bf16.mxu1 %v3049_v9  ;;  %v3136_v8 = vld [vmem:[%s3471_s30 + $0x784] ss:$16 sps:$4 sm:$0xff]   ;;  %v3139_v9 = vld [vmem:[%s3471_s30 + $0x78c] ss:$16 sps:$4 sm:$0xff]  }
 0x10d   : > { %1964 = vmatpush1.bf16.msra.mxu0 %v3044_v10  ;;  %2169 = vmatpush1.bf16.msra.mxu1 %v3047_v11  ;;  %v3134_v10 = vld [vmem:[%s3471_s30 + $0x780] ss:$16 sps:$4 sm:$0xff]   ;;  %v3137_v11 = vld [vmem:[%s3471_s30 + $0x788] ss:$16 sps:$4 sm:$0xff]  }
 0x10e   : > { %1965 = vmatprep.subr.bf16.mxu0 %v3052_v13  ;;  %2170 = vmatprep.subr.bf16.mxu1 %v3055_v14  ;;  %v3142_v13 = vld [vmem:[%s3471_s30 + $0x7a4] ss:$16 sps:$4 sm:$0xff]   ;;  %v3145_v14 = vld [vmem:[%s3471_s30 + $0x7ac] ss:$16 sps:$4 sm:$0xff]  }
 0x111   : > { %1966 = vmatpush1.bf16.msra.mxu0 %v3050_v15  ;;  %2171 = vmatpush1.bf16.msra.mxu1 %v3053_v16  ;;  %v3140_v15 = vld [vmem:[%s3471_s30 + $0x7a0] ss:$16 sps:$4 sm:$0xff]   ;;  %v3143_v16 = vld [vmem:[%s3471_s30 + $0x7a8] ss:$16 sps:$4 sm:$0xff]  }
 0x112   : > { %1967 = vmatprep.subr.bf16.mxu0 %v3058_v17  ;;  %2172 = vmatprep.subr.bf16.mxu1 %v3061_v19  ;;  %v3148_v17 = vld [vmem:[%s3471_s30 + $0x7c4] ss:$16 sps:$4 sm:$0xff]   ;;  %v3151_v19 = vld [vmem:[%s3471_s30 + $0x7cc] ss:$16 sps:$4 sm:$0xff]  }
 0x115   : > { %1968 = vmatpush1.bf16.msra.mxu0 %v3056_v22  ;;  %2173 = vmatpush1.bf16.msra.mxu1 %v3059_v23  ;;  %v492_v22 = vld [vmem:[%s3471_s30 + $0x808] sm:$0x77]  ;;  %v3300_v23 = vmov 65535  }
 0x116   : > { %1978 = vmatprep.subr.bf16.mxu0 %v3064_v24  ;;  %2183 = vmatprep.subr.bf16.mxu1 %v3067_v25  ;;  %v1841_v24 = vsel %vm1839_vm0, 4294967295, %v3300_v23  ;;  %v3146_v25 = vld [vmem:[%s3471_s30 + $0x7c0] ss:$16 sps:$4 sm:$0xff]  }
 0x118   : > { %1970 = vmatmul.mubr.bf16.vlgmr.msra.gmra.mrb[0].mxu0 %v3623_v21  ;;  %2175 = vmatmul.mubr.bf16.vlgmr.msra.gmra.mrb[0].mxu1 %v3623_v21  ;;  %v3077_v21 = vld [vmem:[%s3471_s30 + $0x648] ss:$16 sps:$4 sm:$0xff]  }
 0x119   : > { %1979 = vmatpush1.bf16.msra.mxu0 %v3062_v27  ;;  %2184 = vmatpush1.bf16.msra.mxu1 %v3065_v18  ;;  %v3149_v27 = vld [vmem:[%s3471_s30 + $0x7c8] ss:$16 sps:$4 sm:$0xff]   ;;  %v3154_v18 = vld [vmem:[%s3471_s30 + $0x7e4] ss:$16 sps:$4 sm:$0xff]  }
 0x11a   : > { %1980 = vmatprep.subr.bf16.mxu0 %v3070_v28  ;;  %2185 = vmatprep.subr.bf16.mxu1 %v3073_v29  ;;  %v3157_v28 = vld [vmem:[%s3471_s30 + $0x7ec] ss:$16 sps:$4 sm:$0xff]   ;;  %v2663_v29 = vcombine.high %v491_v20, %v491_v20 }
 0x11b   : > { %2010 = vmatprep.mubr.bf16.mxu0 %v529_v30  ;;  %2215 = vmatprep.mubr.bf16.mxu1 %v529_v30  ;;  %v2665_v30 = vcombine.high %v492_v22, %v492_v22 }
 0x11d   : > { %1981 = vmatpush1.bf16.msra.mxu0 %v3068_v49  ;;  %2186 = vmatpush1.bf16.msra.mxu1 %v3071_v31  ;;  %v1842_v49 = vsel %vm1840_vm1, %v1841_v24, 0  ;;  %v3152_v31 = vld [vmem:[%s3471_s30 + $0x7e0] ss:$16 sps:$4 sm:$0xff]  }
 0x11e   : > { %1982 = vmatprep.subr.bf16.mxu0 %v3076_v32  ;;  %2187 = vmatprep.subr.bf16.mxu1 %v3079_v33  ;;  %v3155_v32 = vld [vmem:[%s3471_s30 + $0x7e8] ss:$16 sps:$4 sm:$0xff]   ;;  %v2662_v33 = vcombine.low %v491_v20, %v491_v20 }
 0x121   : > { %1983 = vmatpush1.bf16.msra.mxu0 %v3074_v34  ;;  %2188 = vmatpush1.bf16.msra.mxu1 %v3077_v21  ;;  %v2664_v34 = vcombine.low %v492_v22, %v492_v22  ;;  %v1847_v21 = vand.u32 %v2663_v29, %v1842_v49 }
 0x122   : > { %1984 = vmatprep.subr.bf16.mxu0 %v3082_v35  ;;  %2189 = vmatprep.subr.bf16.mxu1 %v3085_v36  ;;  %v1853_v35 = vand.u32 %v2665_v30, %v1842_v49  ;;  %v1844_v36 = vand.u32 %v2662_v33, %v1842_v49 }
 0x125   : > { %1985 = vmatpush1.bf16.msra.mxu0 %v3080_v37  ;;  %2190 = vmatpush1.bf16.msra.mxu1 %v3083_v38  ;;  %v1850_v37 = vand.u32 %v2664_v34, %v1842_v49  ;;  %v2405_v38 = vld.sshfl [vmem:[#allocation2 + $0x10] sm:$0x3 pattern:$0x76325410] }
 0x126   : > { %1986 = vmatprep.subr.bf16.mxu0 %v3088_v39  ;;  %2191 = vmatprep.subr.bf16.mxu1 %v3091_v40 }
 0x129   : > { %1987 = vmatpush1.bf16.msra.mxu0 %v3086_v41  ;;  %2192 = vmatpush1.bf16.msra.mxu1 %v3089_v42 }
 0x12a   : > { %1988 = vmatprep.subr.bf16.mxu0 %v3094_v43  ;;  %2193 = vmatprep.subr.bf16.mxu1 %v3097_v44 }
 0x12d   : > { %1989 = vmatpush1.bf16.msra.mxu0 %v3092_v45  ;;  %2194 = vmatpush1.bf16.msra.mxu1 %v3095_v46 }
 0x12e   : > { %1990 = vmatprep.subr.bf16.mxu0 %v3100_v47  ;;  %2195 = vmatprep.subr.bf16.mxu1 %v3103_v48 }
 0x131   : > { %1991 = vmatpush1.bf16.msra.mxu0 %v3098_v50  ;;  %2196 = vmatpush1.bf16.msra.mxu1 %v3101_v51 }
 0x132   : > { %1992 = vmatprep.subr.bf16.mxu0 %v3106_v52  ;;  %2197 = vmatprep.subr.bf16.mxu1 %v3109_v53 }
 0x135   : > { %1993 = vmatpush1.bf16.msra.mxu0 %v3104_v54  ;;  %2198 = vmatpush1.bf16.msra.mxu1 %v3107_v55 }
 0x136   : > { %1994 = vmatprep.subr.bf16.mxu0 %v3112_v56  ;;  %2199 = vmatprep.subr.bf16.mxu1 %v3115_v57 }
 0x139   : > { %1995 = vmatpush1.bf16.msra.mxu0 %v3110_v58  ;;  %2200 = vmatpush1.bf16.msra.mxu1 %v3113_v59 }
 0x13a   : > { %1996 = vmatprep.subr.bf16.mxu0 %v3118_v60  ;;  %2201 = vmatprep.subr.bf16.mxu1 %v3121_v61 }
 0x13d   : > { %1997 = vmatpush1.bf16.msra.mxu0 %v3116_v62  ;;  %2202 = vmatpush1.bf16.msra.mxu1 %v3119_v63 }
 0x13e   : > { %1998 = vmatprep.subr.bf16.mxu0 %v3124_v0  ;;  %2203 = vmatprep.subr.bf16.mxu1 %v3127_v1 }
 0x141   : > { %1999 = vmatpush1.bf16.msra.mxu0 %v3122_v2  ;;  %2204 = vmatpush1.bf16.msra.mxu1 %v3125_v3 }
 0x142   : > { %2000 = vmatprep.subr.bf16.mxu0 %v3130_v4  ;;  %2205 = vmatprep.subr.bf16.mxu1 %v3133_v5 }
 0x145   : > { %2001 = vmatpush1.bf16.msra.mxu0 %v3128_v6  ;;  %2206 = vmatpush1.bf16.msra.mxu1 %v3131_v7 }
 0x146   : > { %2002 = vmatprep.subr.bf16.mxu0 %v3136_v8  ;;  %2207 = vmatprep.subr.bf16.mxu1 %v3139_v9 }
 0x149   : > { %2003 = vmatpush1.bf16.msra.mxu0 %v3134_v10  ;;  %2208 = vmatpush1.bf16.msra.mxu1 %v3137_v11 }
 0x14a   : > { %2004 = vmatprep.subr.bf16.mxu0 %v3142_v13  ;;  %2209 = vmatprep.subr.bf16.mxu1 %v3145_v14 }
 0x14d   : > { %2005 = vmatpush1.bf16.msra.mxu0 %v3140_v15  ;;  %2210 = vmatpush1.bf16.msra.mxu1 %v3143_v16 }
 0x14e   : > { %2006 = vmatprep.subr.bf16.mxu0 %v3148_v17  ;;  %2211 = vmatprep.subr.bf16.mxu1 %v3151_v19 }
 0x151   : > { %2007 = vmatpush1.bf16.msra.mxu0 %v3146_v25  ;;  %2212 = vmatpush1.bf16.msra.mxu1 %v3149_v27 }
 0x152   : > { %2008 = vmatprep.subr.bf16.mxu0 %v3154_v18  ;;  %2213 = vmatprep.subr.bf16.mxu1 %v3157_v28 }
 0x155   : > { %2009 = vmatpush1.bf16.msra.mxu0 %v3152_v31  ;;  %2214 = vmatpush1.bf16.msra.mxu1 %v3155_v32 }
 0x156   : > { %2019 = vmatprep.subr.bf16.mxu0 %v1847_v21  ;;  %2224 = vmatprep.subr.bf16.mxu1 %v1853_v35 }
 0x158   : > { %2011 = vmatmul.mubr.bf16.vlgmr.msra.gmra.mrb[0].mxu0 %v3699_v26  ;;  %2216 = vmatmul.mubr.bf16.vlgmr.msra.gmra.mrb[0].mxu1 %v3699_v26 }
 0x159   : > { %2020 = vmatpush1.bf16.msra.mxu0 %v1844_v36  ;;  %2225 = vmatpush1.bf16.msra.mxu1 %v1850_v37 }
 0x15a   : > { %2051 = vmatprep.mubr.bf16.mxu0 %v3299_v12  ;;  %2256 = vmatprep.mubr.bf16.mxu1 %v3299_v12 }
 0x15e   : > { %v2269_v39 = vpop.permute.xlu0 %2268 }
 0x162   : > { %v2279_v40 = vpop.permute.xlu0 %2278 }
 0x164   : > { %2666 = vmatmul.mubr.msk.bf16.vlgmr.msra.gmra.mrb[0].mxu0 %vm1835_vm2, %v2405_v38  ;;  %2667 = vmatmul.mubr.msk.bf16.vlgmr.msra.gmra.mrb[0].mxu1 %vm1835_vm2, %v2405_v38 }
 0x237   : > { %v2053_v41 = vpop.f32.mrb[0].mxu0  ;;  %v2258_v42 = vpop.f32.mrb[0].mxu1 }
 0x238   : > { %v2271_v43 = vmul.f32 %v2269_v39, %v2053_v41  ;;  %v2273_v44 = vmul.f32 %v2269_v39, %v2258_v42  ;;  %v2055_v45 = vpop.f32.mrb[1].mxu0  ;;  %v2260_v26 = vpop.f32.mrb[1].mxu1 }
 0x239   : > { %v2272_v46 = vmul.f32 %v2269_v39, %v2055_v45  ;;  %v2274_v47 = vmul.f32 %v2269_v39, %v2260_v26  ;;  %v2057_v48 = vpop.f32.mrb[2].mxu0  ;;  %v2262_v50 = vpop.f32.mrb[2].mxu1 }
 0x23a   : > { %v2281_v51 = vadd.f32 %v2279_v40, %v2271_v43  ;;  %v2283_v12 = vadd.f32 %v2279_v40, %v2273_v44  ;;  %v2058_v52 = vpop.f32.mrb[3].mxu0  ;;  %v2263_v53 = vpop.f32.mrb[3].mxu1 }
 0x23b   : > { %v2282_v54 = vadd.f32 %v2279_v40, %v2272_v46  ;;  %v2284_v55 = vadd.f32 %v2279_v40, %v2274_v47 }
 0x23c   : > { %v2285_v56 = vmax.f32 %v2281_v51, 0.0  ;;  %v2287_v57 = vmax.f32 %v2283_v12, 0.0 }
 0x23d   : > { %v2286_v58 = vmax.f32 %v2282_v54, 0.0  ;;  %v2288_v59 = vmax.f32 %v2284_v55, 0.0 }
 0x23f   : > { %v2293_v60 = vcombine.low %v2285_v56, %v2286_v58  ;;  %v2294_v61 = vcombine.low %v2287_v57, %v2288_v59 }
 0x241   : > { %2297 = vst [vmem:[%s228_s7] sm:$0xff] %v2293_v60  ;;  %2298 = vst [vmem:[%s228_s7 + $0x8] sm:$0xff] %v2294_v61 }
 0x242   : > { %3234 = shalt.err (!%p3231_p13)
}
 0x243   : > { %s3235_s9 = scalar_lea.hbm %s3778_s14, 256  ;;  %s3239_s29 = scalar_lea.hbm %s3826_s4, 512 }
 0x244   : > { %p3236_p7 = scmp.ne.s32.totalorder %s3778_s14, %s3235_s9  ;;  %p3240_p1 = scmp.lt.u32.totalorder %s3778_s14, %s3826_s4 }
 0x245   : > { %p3241_p8 = scmp.lt.u32.totalorder %s3239_s29, %s3235_s9  ;;  %p3243_p9 = scmp.lt.u32.totalorder %s3235_s9, %s3778_s14 }
 0x246   : > { %p3237_p3 = pnand %p3236_p7, %p3845_p10 }
 0x247   : > { %p3242_p11 = por %p3241_p8, %p3240_p1 }
 0x248   : > { %p3238_p12 = pneg %p3237_p3 }
 0x249   : > { %p3244_p2 = por %p3243_p9, %p3242_p11 }
 0x24b   : > { %p3245_p4 = pnand %p3244_p2, %p3238_p12 }
 0x24d   : > { %3248 = shalt.err (!%p3245_p4)
}
 0x24e   : > { %2715 = dma.vmem_to_hbm [thread:$0]  (%p3845_p10), %s3780_s10, 256, %s3778_s14, %s2300_s22  }
 0x24f PF: > { %s2326_s20 = sand.u32 1, %s3279_s15   ;;  %p3846_p5 = scmp.ne.s32.totalorder %s3835_s28, 0 }
 0x250   : > { %p3847_p0 = scmp.ge.s32.totalorder %s3291_s18, 2  ;;  %s2327_s6 = scalar_lea.sflag [#allocation4], %s2326_s20 }
 0x252   : > { %p2726_p6 = pnand %p3847_p0, %p3846_p5 }
 0x254   : > { %3274 = dma.done.wait (!%p2726_p6), %s2327_s6, 256  }
 0x255   : > { %3276 = vsyncadd (!%p2726_p6), %s2327_s6, 4294967040  ;;  %p18_p13 = scmp.ge.s32.totalorder %s3352_s21, 4   ;;  %s3848_s15 = smov %s3283_s16 }
 0x256   : > { %s3849_s16 = smov %s3287_s17  ;;  %s3850_s17 = smov %s3364_s24 }
 0x257   : > { %s3851_s18 = smov %s3352_s21  ;;  %20 = sbr.rel (!%p18_p13) target bundleno = 6 (0x6), region = 86 }
 0x25e   :  { %2332 = vsyncpa [#allocation3], 1 }
 0x25f   :  { %2334 = vsyncpa [#allocation3 + $0x1], 1 }
 0x260   :  { %2335 = vsyncpa [#allocation6], 1 }
 0x261   :  { %2337 = vsyncpa [#allocation6 + $0x1], 1 }
 0x262   :  { %2338 = vsyncpa [#allocation4], 1 }
 0x263   :  { %2340 = vsyncpa [#allocation4 + $0x1], 1 }

</bundles_post_ra>
